<compile_context>
chip_gen: v7x
topology: tpu7x:2x2x1
jax: 0.10.0
libtpu: 0.0.40
codegen_flags: <defaults>
</compile_context>

<pallas_src>
import functools
import math

import jax
import jax.numpy as jnp
from jax.experimental import pallas as pl
from jax.experimental.pallas import tpu as pltpu


def _chunk_double_kernel(x_ref, *out_refs, dim, starts, sizes):
    # Per-chunk: load the chunk slice once from the input block, double it,
    # and store it as one full (lane-dense) output block. No full-size
    # intermediate, single load per element.
    nd = len(x_ref.shape)
    for o_ref, st, sz in zip(out_refs, starts, sizes):
        idx = tuple(
            slice(st, st + sz) if d == dim else slice(None) for d in range(nd)
        )
        xc = x_ref[idx]
        o_ref[...] = xc + xc


def _torch_chunk_splits(size, chunks):
    # torch.chunk semantics: ceil(size/chunks) per chunk, last chunk may be
    # smaller; may return fewer than `chunks` chunks.
    chunk_size = -(-size // chunks)
    starts = tuple(range(0, size, chunk_size))
    sizes = tuple(min(chunk_size, size - s) for s in starts)
    return starts, sizes


def simple_chunk_model(x, chunks, dimension):
    """Pallas implementation of SimpleChunkModel.forward."""
    ndim = x.ndim
    dim = dimension % ndim
    S = x.shape[dim]
    starts, sizes = _torch_chunk_splits(S, chunks)

    lead = tuple(x.shape[:dim])
    trail = tuple(x.shape[dim + 1:])
    L = math.prod(lead)   # == 1 if lead is empty
    T = math.prod(trail)  # == 1 if dim is the last axis

    itemsize = jnp.dtype(x.dtype).itemsize
    elem_budget = (1 << 20) // itemsize  # ~1 MiB per input block

    if T > 1:
        # ---- Lane-dense layout: (L, S, T), chunk slicing on the middle axis.
        x_in = x.reshape(L, S, T)

        # Lane-axis tile: whole T if modest, else a 128-multiple tile.
        if T <= 4096 or T % 128 != 0:
            tile_T = T
        else:
            tile_T = 4096
        tile_L = max(1, min(L, elem_budget // max(1, S * tile_T)))

        grid = (pl.cdiv(L, tile_L), pl.cdiv(T, tile_T))
        in_specs = [pl.BlockSpec((tile_L, S, tile_T), lambda i, j: (i, 0, j))]
        out_specs = tuple(
            pl.BlockSpec((tile_L, sz, tile_T), lambda i, j: (i, 0, j))
            for sz in sizes
        )
        out_shapes = tuple(
            jax.ShapeDtypeStruct((L, sz, T), x.dtype) for sz in sizes
        )
        dim_sem = ("parallel", "parallel")
    else:
        # ---- Chunk dim is the last axis: layout (L, S), S on lanes.
        # TODO(synk): if chunk sizes are not multiples of 128 these stores are
        # masked (vst.msk); padding chunk boundaries to 128 would avoid that.
        x_in = x.reshape(L, S)

        tile_L = min(L, max(1, elem_budget // max(1, S)))
        if tile_L < L:
            tile_L = max(8, (tile_L // 8) * 8)  # keep sublane dim 8-aligned

        grid = (pl.cdiv(L, tile_L),)
        in_specs = [pl.BlockSpec((tile_L, S), lambda i: (i, 0))]
        out_specs = tuple(
            pl.BlockSpec((tile_L, sz), lambda i: (i, 0)) for sz in sizes
        )
        out_shapes = tuple(
            jax.ShapeDtypeStruct((L, sz), x.dtype) for sz in sizes
        )
        dim_sem = ("parallel",)

    kernel = functools.partial(
        _chunk_double_kernel, dim=1, starts=starts, sizes=sizes
    )

    outs = pl.pallas_call(
        kernel,
        out_shape=out_shapes,
        grid=grid,
        in_specs=in_specs,
        out_specs=out_specs,
        compiler_params=pltpu.CompilerParams(
            dimension_semantics=dim_sem,
            vmem_limit_bytes=32 * 1024 * 1024,
        ),
    )(x_in)

    # Free (contiguous) reshape back to the original chunked layout.
    return tuple(o.reshape(lead + (sz,) + trail) for o, sz in zip(outs, sizes))


def _reference_chunks(x, chunks, dimension):
    # Plain-JAX reference with torch.chunk semantics.
    dim = dimension % x.ndim
    y = x + x
    size = x.shape[dim]
    chunk_size = -(-size // chunks)
    return [
        jax.lax.slice_in_dim(y, s, min(s + chunk_size, size), axis=dim)
        for s in range(0, size, chunk_size)
    ]


if __name__ == "__main__":
    key = jax.random.PRNGKey(0)
    x = jax.random.normal(key, (2, 4, 16, 16), dtype=jnp.float32)

    # Primary config (matches the test's constructor-arg pattern): chunk C.
    chunks, dimension = 2, 1
    outs = simple_chunk_model(x, chunks, dimension)
    outs = jax.block_until_ready(outs)
    ref = _reference_chunks(x, chunks, dimension)
    assert len(outs) == len(ref)
    for o, r in zip(outs, ref):
        assert o.shape == r.shape and o.dtype == r.dtype
        assert jnp.allclose(o, r), "mismatch vs reference (dim=1)"

    # Secondary config exercising the last-axis (lane-split) path.
    outs2 = jax.block_until_ready(simple_chunk_model(x, 2, 3))
    ref2 = _reference_chunks(x, 2, 3)
    assert len(outs2) == len(ref2)
    for o, r in zip(outs2, ref2):
        assert o.shape == r.shape and o.dtype == r.dtype
        assert jnp.allclose(o, r), "mismatch vs reference (dim=3)"

    print("KERNEL_OK")
</pallas_src>

<mosaic_0001>
module attributes {stable_mosaic.version = 11 : i64} {
  func.func @_chunk_double_kernel(%arg0: i32, %arg1: i32, %arg2: memref<2x4x256xf32, #tpu.memory_space<vmem>>, %arg3: memref<2x2x256xf32, #tpu.memory_space<vmem>>, %arg4: memref<2x2x256xf32, #tpu.memory_space<vmem>>) attributes {dimension_semantics = [#tpu.dimension_semantics<parallel>, #tpu.dimension_semantics<parallel>], iteration_bounds = array<i64: 1, 1>, scalar_prefetch = 0 : i64, scratch_operands = 0 : i64, tpu.core_type = #tpu.core_type<tc>, window_params = [{transform_indices = @transform_0, window_bounds = array<i64: 2, 4, 256>}, {transform_indices = @transform_1, window_bounds = array<i64: 2, 2, 256>}, {transform_indices = @transform_2, window_bounds = array<i64: 2, 2, 256>}]} {
    %c0 = arith.constant 0 : index
    %c0_0 = arith.constant 0 : index
    %c0_1 = arith.constant 0 : index
    %0 = vector.load %arg2[%c0, %c0_0, %c0_1] : memref<2x4x256xf32, #tpu.memory_space<vmem>>, vector<2x2x256xf32>
    %1 = arith.addf %0, %0 : vector<2x2x256xf32>
    %c0_2 = arith.constant 0 : index
    %c0_3 = arith.constant 0 : index
    %c0_4 = arith.constant 0 : index
    %2 = vector.load %arg3[%c0_2, %c0_3, %c0_4] : memref<2x2x256xf32, #tpu.memory_space<vmem>>, vector<2x2x256xf32>
    tpu.vector_store %arg3[%c0_2, %c0_3, %c0_4], %1 {strides = array<i32>} : memref<2x2x256xf32, #tpu.memory_space<vmem>>, vector<2x2x256xf32>,
    %c0_5 = arith.constant 0 : index
    %c2 = arith.constant 2 : index
    %c0_6 = arith.constant 0 : index
    %3 = vector.load %arg2[%c0_5, %c2, %c0_6] : memref<2x4x256xf32, #tpu.memory_space<vmem>>, vector<2x2x256xf32>
    %4 = arith.addf %3, %3 : vector<2x2x256xf32>
    %c0_7 = arith.constant 0 : index
    %c0_8 = arith.constant 0 : index
    %c0_9 = arith.constant 0 : index
    %5 = vector.load %arg4[%c0_7, %c0_8, %c0_9] : memref<2x2x256xf32, #tpu.memory_space<vmem>>, vector<2x2x256xf32>
    tpu.vector_store %arg4[%c0_7, %c0_8, %c0_9], %4 {strides = array<i32>} : memref<2x2x256xf32, #tpu.memory_space<vmem>>, vector<2x2x256xf32>,
    return
  }
  func.func @transform_0(%arg0: i32, %arg1: i32) -> (i32, i32, i32) {
    %c0_i32 = arith.constant 0 : i32
    %c0_i32_0 = arith.constant 0 : i32
    return %arg0, %c0_i32, %arg1 : i32, i32, i32
  }
  func.func @transform_1(%arg0: i32, %arg1: i32) -> (i32, i32, i32) {
    %c0_i32 = arith.constant 0 : i32
    %c0_i32_0 = arith.constant 0 : i32
    return %arg0, %c0_i32, %arg1 : i32, i32, i32
  }
  func.func @transform_2(%arg0: i32, %arg1: i32) -> (i32, i32, i32) {
    %c0_i32 = arith.constant 0 : i32
    %c0_i32_0 = arith.constant 0 : i32
    return %arg0, %c0_i32, %arg1 : i32, i32, i32
  }
}

</mosaic_0001>

<bundles_post_ra>
// kernel: tpu_custom_call.1
= control target key start
LH: loop header
LB: loop body
LE: loop exit
PB: predicated region body
PF: predicated region fallthrough
CT: control target
= control target key end

     0   :  { %8 = vsyncpa [#allocation3], 0  ;;  %s250_s0 = inlined_call_operand.hbm [shape: f32[2,4,256], index: 0, kind: input, shape index: {}]   ;;  %s251_s1 = inlined_call_operand.hbm [shape: f32[2,2,256], index: 1, kind: output, shape index: {0}]   ;;  %s252_s2 = inlined_call_operand.hbm [shape: f32[2,2,256], index: 2, kind: output, shape index: {1}]  }
   0x1   :  { %9 = vsyncpa [#allocation4], 0 }
   0x2   :  { %10 = vsyncpa [#allocation7], 0  ;;  %s191_s9 = smov [#allocation2]   ;;  %s119_s13 = scalar_lea.hbm %s250_s0, 256 }
   0x3   :  { %s16_s10 = sshll.u32 %s191_s9, 4  ;;  %p120_p0 = scmp.ne.s32.totalorder %s250_s0, %s119_s13  ;;  %s17_s10 = int_to_ptr.vmem [resolvable:$true] %s16_s10 }
   0x4   :  { %p123_p1 = scmp.lt.u32.totalorder %s119_s13, %s250_s0 }
   0x6   :  { %p125_p2 = pnand %p123_p1, %p120_p0 }
   0x8   :  { %128 = shalt.err (!%p125_p2)
}
   0x9   :  { %s129_s18 = scalar_lea.vmem %s17_s10, 256  ;;  %p134_p4 = scmp.lt.s32.totalorder %s17_s10, %s17_s10 }
   0xa   :  { %p130_p3 = scmp.ne.s32.totalorder %s17_s10, %s129_s18  ;;  %p135_p5 = scmp.lt.s32.totalorder %s129_s18, %s129_s18 }
   0xc   :  { %p136_p6 = por %p135_p5, %p134_p4 }
   0xe   :  { %p137_p7 = pnand %p136_p6, %p130_p3 }
  0x10   :  { %140 = shalt.err (!%p137_p7)
}
  0x11   :  { %s192_s19 = smov 128   ;;  %s193_s20 = smov 8  }
  0x12   :  { %22 = dma.hbm_to_vmem [thread:$0]  %s250_s0, 256, %s17_s10, [#allocation3], %s192_s19, %s192_s19, %s193_s20  }
  0x13   :  { %185 = dma.done.wait [#allocation3], 256  }
  0x14   :  { %186 = vsyncadd [#allocation3], 4294967040  ;;  %v59_v0 = vlaneseq  ;;  %v194_v1 = vmov 1983009808   ;;  %s195_s23 = smov [#allocation5]   ;;  %s196_s0 = smov [#allocation6]  }
  0x15   :  { %v57_v2 = vunpack.c.l.s4 %v194_v1  ;;  %s81_s24 = sshll.u32 %s195_s23, 4  ;;  %v26_v6 = vld [vmem:[#allocation2] sm:$0x33]  ;;  %v27_v7 = vld [vmem:[#allocation2 + $0x8] sm:$0x33]  ;;  %s93_s25 = sshll.u32 %s196_s0, 4  ;;  %s82_s24 = int_to_ptr.vmem [resolvable:$true] %s81_s24  ;;  %s94_s25 = int_to_ptr.vmem [resolvable:$true] %s93_s25 }
  0x16   :  { %v60_v3 = vshrl.u32 %v59_v0, 7  ;;  %v50_v8 = vld [vmem:[#allocation2] sm:$0xcc]  ;;  %v28_v9 = vadd.f32 %v26_v6, %v26_v6  ;;  %v29_v10 = vadd.f32 %v27_v7, %v27_v7  ;;  %v51_v12 = vld [vmem:[#allocation2 + $0x8] sm:$0xcc]  ;;  %s141_s26 = scalar_lea.vmem %s82_s24, 128  ;;  %p146_p9 = scmp.lt.s32.totalorder %s82_s24, %s82_s24 }
  0x17   :  { %v58_v4 = vunpack.c.0.s8 %v57_v2  ;;  %v52_v11 = vadd.f32 %v50_v8, %v50_v8  ;;  %v53_v13 = vadd.f32 %v51_v12, %v51_v12  ;;  %p142_p8 = scmp.ne.s32.totalorder %s82_s24, %s141_s26  ;;  %p147_p10 = scmp.lt.s32.totalorder %s141_s26, %s141_s26 }
  0x18   :  { %109 = vst.sshfl [vmem:[#allocation5] sm:$0x33 pattern:$0x76325410] %v28_v9 }
  0x19   :  { %v61_v5 = vsub.s32 %v58_v4, %v60_v3  ;;  %110 = vst.sshfl [vmem:[#allocation5 + $0x4] sm:$0x33 pattern:$0x76325410] %v29_v10  ;;  %p148_p11 = por %p147_p10, %p146_p9 }
  0x1b   :  { %v62_v14 = vrot.slane %v52_v11, %v61_v5  ;;  %v70_v15 = vrot.slane %v53_v13, %v61_v5  ;;  %p149_p12 = pnand %p148_p11, %p142_p8 }
  0x1d   :  { %152 = shalt.err (!%p149_p12)
}
  0x1e   :  { %s153_s29 = scalar_lea.hbm %s251_s1, 128 }
  0x1f   :  { %p154_p13 = scmp.ne.s32.totalorder %s251_s1, %s153_s29  ;;  %p157_p0 = scmp.lt.u32.totalorder %s153_s29, %s251_s1 }
  0x21   :  { %p159_p1 = pnand %p157_p0, %p154_p13 }
  0x23   :  { %162 = shalt.err (!%p159_p1)
}
  0x24   :  { %s197_s6 = smov 64   ;;  %s198_s7 = smov 4   ;;  %v63_v16 = vcombine.high %v62_v14, %v62_v14  ;;  %v71_v17 = vcombine.high %v70_v15, %v70_v15 }
  0x25   :  { %87 = dma.vmem_to_hbm [thread:$0]  %s82_s24, 128, %s251_s1, [#allocation4], %s197_s6, %s197_s6, %s198_s7  }
  0x26   :  { %74 = vst [vmem:[#allocation6] sm:$0xf] %v63_v16  ;;  %75 = vst [vmem:[#allocation6 + $0x4] sm:$0xf] %v71_v17  ;;  %s163_s10 = scalar_lea.vmem %s94_s25, 128  ;;  %p168_p3 = scmp.lt.s32.totalorder %s94_s25, %s94_s25 }
  0x27   :  { %p164_p2 = scmp.ne.s32.totalorder %s94_s25, %s163_s10  ;;  %p169_p4 = scmp.lt.s32.totalorder %s163_s10, %s163_s10 }
  0x29   :  { %p170_p5 = por %p169_p4, %p168_p3 }
  0x2b   :  { %p171_p6 = pnand %p170_p5, %p164_p2 }
  0x2d   :  { %174 = shalt.err (!%p171_p6)
}
  0x2e   :  { %s175_s13 = scalar_lea.hbm %s252_s2, 128 }
  0x2f   :  { %p176_p7 = scmp.ne.s32.totalorder %s252_s2, %s175_s13  ;;  %p179_p8 = scmp.lt.u32.totalorder %s175_s13, %s252_s2 }
  0x31   :  { %p181_p9 = pnand %p179_p8, %p176_p7 }
  0x33   :  { %184 = shalt.err (!%p181_p9)
}
  0x34   :  { %99 = dma.vmem_to_hbm [thread:$0]  %s94_s25, 128, %s252_s2, [#allocation7], %s197_s6, %s197_s6, %s198_s7  }
  0x35   :  { %187 = dma.done.wait [#allocation4], 128  }
  0x36   :  { %188 = vsyncadd [#allocation4], 4294967168 }
  0x37   :  { %189 = dma.done.wait [#allocation7], 128  }
  0x38   :  { %190 = vsyncadd [#allocation7], 4294967168 }
  0x39   :  { %106 = vsyncpa [#allocation3], 1 }
  0x3a   :  { %107 = vsyncpa [#allocation4], 1 }
  0x3b   :  { %108 = vsyncpa [#allocation7], 1 }

</bundles_post_ra>
